<compile_context>
chip_gen: v7x
topology: tpu7x:2x2x1
jax: 0.10.0
libtpu: 0.0.40
codegen_flags: <defaults>
</compile_context>

<pallas_src>
import functools

import jax
import jax.numpy as jnp
from jax.experimental import pallas as pl
from jax.experimental.pallas import tpu as pltpu


def _round_up(x: int, m: int) -> int:
    return ((x + m - 1) // m) * m


def _mlp_fused_kernel(*refs, num_layers: int):
    """refs = (x_ref, w0, b0, w1, b1, ..., o_ref). Layers unrolled in Python."""
    x_ref = refs[0]
    o_ref = refs[-1]
    h = x_ref[...].astype(jnp.float32)
    for i in range(num_layers):
        w = refs[1 + 2 * i][...]
        b = refs[2 + 2 * i][...].astype(jnp.float32)  # (1, out) broadcasts
        h = jnp.dot(h, w, preferred_element_type=jnp.float32) + b
        if i < num_layers - 1:
            h = jnp.maximum(h, 0.0)  # ReLU on hidden layers only
    o_ref[...] = h.astype(o_ref.dtype)


def mlp_forward(x, params, *, max_row_tile: int = 2048):
    """Fused MLP forward: one pallas_call for all layers.

    x: (B, input_dim); params: list of (w (in, out), b (1, out)).
    No feature padding: feature block dims equal the full array dims.
    """
    B, in_dim = x.shape
    out_dim = params[-1][0].shape[1]
    num_layers = len(params)
    dtype = x.dtype

    # Batch tiling: full-extent single block for small B, otherwise >= 2
    # parallel steps (v7x megacore) with a tile that is a multiple of 256.
    if B <= 256:
        tile_b = B
    else:
        tile_b = min(max_row_tile, _round_up(pl.cdiv(B, 2), 256))
    grid = (pl.cdiv(B, tile_b),)

    in_specs = [pl.BlockSpec((tile_b, in_dim), lambda i: (i, 0))]
    flat_wb = []
    for (w, b) in params:
        n, k = w.shape
        flat_wb += [w, b.reshape(1, k)]
        # Constant index_map -> weights/biases DMA'd once, stay resident in
        # VMEM across all batch-grid iterations.
        in_specs += [
            pl.BlockSpec((n, k), lambda i: (0, 0)),
            pl.BlockSpec((1, k), lambda i: (0, 0)),
        ]

    kernel = functools.partial(_mlp_fused_kernel, num_layers=num_layers)

    return pl.pallas_call(
        kernel,
        out_shape=jax.ShapeDtypeStruct((B, out_dim), dtype),
        grid=grid,
        in_specs=in_specs,
        out_specs=pl.BlockSpec((tile_b, out_dim), lambda i: (i, 0)),
        compiler_params=pltpu.CompilerParams(
            dimension_semantics=("parallel",),
        ),
    )(x, *flat_wb)


def init_mlp_params(key, input_dim, hidden_dim, num_layers, output_dim,
                    dtype=jnp.float32):
    """Deterministic init matching nn.Linear shapes (weights stored transposed)."""
    h = [hidden_dim] * (num_layers - 1)
    dims_in = [input_dim] + h
    dims_out = h + [output_dim]
    params = []
    for n, k in zip(dims_in, dims_out):
        key, kw, kb = jax.random.split(key, 3)
        bound = 1.0 / jnp.sqrt(jnp.float32(n))
        # PyTorch Linear: weight (k, n), bias (k); we store weight as (n, k).
        w = jax.random.uniform(kw, (n, k), dtype, minval=-bound, maxval=bound)
        b = jax.random.uniform(kb, (1, k), dtype, minval=-bound, maxval=bound)
        params.append((w, b))
    return params


def mlp_reference(x, params):
    num_layers = len(params)
    for i, (w, b) in enumerate(params):
        x = x @ w + b
        if i < num_layers - 1:
            x = jnp.maximum(x, 0.0)
    return x


if __name__ == "__main__":
    # Config consistent with EfdModuleConfig: input_dim=32, hidden_dim=32,
    # num_layers=3; output_dim chosen as 16 (e.g. 4*order for order=4).
    input_dim, hidden_dim, num_layers, output_dim = 32, 32, 3, 16

    key = jax.random.PRNGKey(0)
    key, kx = jax.random.split(key)
    params = init_mlp_params(key, input_dim, hidden_dim, num_layers, output_dim)

    # Small batch: single full-extent block path.
    batch = 8
    x = jax.random.normal(kx, (batch, input_dim), jnp.float32)
    out = jax.block_until_ready(mlp_forward(x, params))
    ref = mlp_reference(x, params)
    assert out.shape == (batch, output_dim)
    assert jnp.allclose(out, ref, atol=1e-5, rtol=1e-5)

    # Mid batch: exercises >= 2 parallel grid steps + a partial trailing block.
    key, kx2 = jax.random.split(key)
    batch2 = 300
    x2 = jax.random.normal(kx2, (batch2, input_dim), jnp.float32)
    out2 = jax.block_until_ready(mlp_forward(x2, params))
    ref2 = mlp_reference(x2, params)
    assert out2.shape == (batch2, output_dim)
    assert jnp.allclose(out2, ref2, atol=1e-5, rtol=1e-5)

    print("KERNEL_OK")
</pallas_src>

<mosaic_0001>
module attributes {stable_mosaic.version = 11 : i64} {
  func.func @_mlp_fused_kernel(%arg0: i32, %arg1: memref<8x32xf32, #tpu.memory_space<vmem>>, %arg2: memref<32x32xf32, #tpu.memory_space<vmem>>, %arg3: memref<1x32xf32, #tpu.memory_space<vmem>>, %arg4: memref<32x32xf32, #tpu.memory_space<vmem>>, %arg5: memref<1x32xf32, #tpu.memory_space<vmem>>, %arg6: memref<32x16xf32, #tpu.memory_space<vmem>>, %arg7: memref<1x16xf32, #tpu.memory_space<vmem>>, %arg8: memref<8x16xf32, #tpu.memory_space<vmem>>) attributes {dimension_semantics = [#tpu.dimension_semantics<parallel>], iteration_bounds = array<i64: 1>, scalar_prefetch = 0 : i64, scratch_operands = 0 : i64, tpu.core_type = #tpu.core_type<tc>, window_params = [{transform_indices = @transform_0, window_bounds = array<i64: 8, 32>}, {pipeline_mode = #tpu.pipeline_mode<synchronous>, transform_indices = @transform_1, window_bounds = array<i64: 32, 32>}, {pipeline_mode = #tpu.pipeline_mode<synchronous>, transform_indices = @transform_2, window_bounds = array<i64: 1, 32>}, {pipeline_mode = #tpu.pipeline_mode<synchronous>, transform_indices = @transform_3, window_bounds = array<i64: 32, 32>}, {pipeline_mode = #tpu.pipeline_mode<synchronous>, transform_indices = @transform_4, window_bounds = array<i64: 1, 32>}, {pipeline_mode = #tpu.pipeline_mode<synchronous>, transform_indices = @transform_5, window_bounds = array<i64: 32, 16>}, {pipeline_mode = #tpu.pipeline_mode<synchronous>, transform_indices = @transform_6, window_bounds = array<i64: 1, 16>}, {transform_indices = @transform_7, window_bounds = array<i64: 8, 16>}]} {
    %c0 = arith.constant 0 : index
    %c0_0 = arith.constant 0 : index
    %0 = vector.load %arg1[%c0, %c0_0] : memref<8x32xf32, #tpu.memory_space<vmem>>, vector<8x32xf32>
    %c0_1 = arith.constant 0 : index
    %c0_2 = arith.constant 0 : index
    %1 = vector.load %arg2[%c0_1, %c0_2] : memref<32x32xf32, #tpu.memory_space<vmem>>, vector<32x32xf32>
    %c0_3 = arith.constant 0 : index
    %c0_4 = arith.constant 0 : index
    %2 = vector.load %arg3[%c0_3, %c0_4] : memref<1x32xf32, #tpu.memory_space<vmem>>, vector<1x32xf32>
    %cst = arith.constant dense<0.000000e+00> : vector<8x32xf32>
    %3 = tpu.matmul %0, %1, %cst {dimension_numbers = #tpu.dot_dimension_numbers<[1], [0], [0], [1], [0, 0, 1, 1], [], []>} : vector<8x32xf32>, vector<32x32xf32>, vector<8x32xf32> -> vector<8x32xf32>
    %4 = vector.broadcast %2 : vector<1x32xf32> to vector<8x32xf32>
    %5 = arith.addf %3, %4 : vector<8x32xf32>
    %cst_5 = arith.constant 0.000000e+00 : f32
    %6 = vector.broadcast %cst_5 : f32 to vector<8x32xf32>
    %7 = arith.maximumf %5, %6 : vector<8x32xf32>
    %c0_6 = arith.constant 0 : index
    %c0_7 = arith.constant 0 : index
    %8 = vector.load %arg4[%c0_6, %c0_7] : memref<32x32xf32, #tpu.memory_space<vmem>>, vector<32x32xf32>
    %c0_8 = arith.constant 0 : index
    %c0_9 = arith.constant 0 : index
    %9 = vector.load %arg5[%c0_8, %c0_9] : memref<1x32xf32, #tpu.memory_space<vmem>>, vector<1x32xf32>
    %cst_10 = arith.constant dense<0.000000e+00> : vector<8x32xf32>
    %10 = tpu.matmul %7, %8, %cst_10 {dimension_numbers = #tpu.dot_dimension_numbers<[1], [0], [0], [1], [0, 0, 1, 1], [], []>} : vector<8x32xf32>, vector<32x32xf32>, vector<8x32xf32> -> vector<8x32xf32>
    %11 = vector.broadcast %9 : vector<1x32xf32> to vector<8x32xf32>
    %12 = arith.addf %10, %11 : vector<8x32xf32>
    %cst_11 = arith.constant 0.000000e+00 : f32
    %13 = vector.broadcast %cst_11 : f32 to vector<8x32xf32>
    %14 = arith.maximumf %12, %13 : vector<8x32xf32>
    %c0_12 = arith.constant 0 : index
    %c0_13 = arith.constant 0 : index
    %15 = vector.load %arg6[%c0_12, %c0_13] : memref<32x16xf32, #tpu.memory_space<vmem>>, vector<32x16xf32>
    %c0_14 = arith.constant 0 : index
    %c0_15 = arith.constant 0 : index
    %16 = vector.load %arg7[%c0_14, %c0_15] : memref<1x16xf32, #tpu.memory_space<vmem>>, vector<1x16xf32>
    %cst_16 = arith.constant dense<0.000000e+00> : vector<8x16xf32>
    %17 = tpu.matmul %14, %15, %cst_16 {dimension_numbers = #tpu.dot_dimension_numbers<[1], [0], [0], [1], [0, 0, 1, 1], [], []>} : vector<8x32xf32>, vector<32x16xf32>, vector<8x16xf32> -> vector<8x16xf32>
    %18 = vector.broadcast %16 : vector<1x16xf32> to vector<8x16xf32>
    %19 = arith.addf %17, %18 : vector<8x16xf32>
    %c0_17 = arith.constant 0 : index
    %c0_18 = arith.constant 0 : index
    %20 = vector.load %arg8[%c0_17, %c0_18] : memref<8x16xf32, #tpu.memory_space<vmem>>, vector<8x16xf32>
    tpu.vector_store %arg8[%c0_17, %c0_18], %19 {strides = array<i32>} : memref<8x16xf32, #tpu.memory_space<vmem>>, vector<8x16xf32>,
    return
  }
  func.func @transform_0(%arg0: i32) -> (i32, i32) {
    %c0_i32 = arith.constant 0 : i32
    %c0_i32_0 = arith.constant 0 : i32
    return %arg0, %c0_i32 : i32, i32
  }
  func.func @transform_1(%arg0: i32) -> (i32, i32) {
    %c0_i32 = arith.constant 0 : i32
    %c0_i32_0 = arith.constant 0 : i32
    %c0_i32_1 = arith.constant 0 : i32
    return %c0_i32, %c0_i32_0 : i32, i32
  }
  func.func @transform_2(%arg0: i32) -> (i32, i32) {
    %c0_i32 = arith.constant 0 : i32
    %c0_i32_0 = arith.constant 0 : i32
    %c0_i32_1 = arith.constant 0 : i32
    return %c0_i32, %c0_i32_0 : i32, i32
  }
  func.func @transform_3(%arg0: i32) -> (i32, i32) {
    %c0_i32 = arith.constant 0 : i32
    %c0_i32_0 = arith.constant 0 : i32
    %c0_i32_1 = arith.constant 0 : i32
    return %c0_i32, %c0_i32_0 : i32, i32
  }
  func.func @transform_4(%arg0: i32) -> (i32, i32) {
    %c0_i32 = arith.constant 0 : i32
    %c0_i32_0 = arith.constant 0 : i32
    %c0_i32_1 = arith.constant 0 : i32
    return %c0_i32, %c0_i32_0 : i32, i32
  }
  func.func @transform_5(%arg0: i32) -> (i32, i32) {
    %c0_i32 = arith.constant 0 : i32
    %c0_i32_0 = arith.constant 0 : i32
    %c0_i32_1 = arith.constant 0 : i32
    return %c0_i32, %c0_i32_0 : i32, i32
  }
  func.func @transform_6(%arg0: i32) -> (i32, i32) {
    %c0_i32 = arith.constant 0 : i32
    %c0_i32_0 = arith.constant 0 : i32
    %c0_i32_1 = arith.constant 0 : i32
    return %c0_i32, %c0_i32_0 : i32, i32
  }
  func.func @transform_7(%arg0: i32) -> (i32, i32) {
    %c0_i32 = arith.constant 0 : i32
    %c0_i32_0 = arith.constant 0 : i32
    return %arg0, %c0_i32 : i32, i32
  }
}

</mosaic_0001>

<bundles_post_ra>
// kernel: tpu_custom_call.1
= control target key start
LH: loop header
LB: loop body
LE: loop exit
PB: predicated region body
PF: predicated region fallthrough
CT: control target
= control target key end

     0   :  { %12 = vsyncpa [#allocation3], 0  ;;  %s554_s0 = inlined_call_operand.vmem [shape: f32[8,32], index: 0, kind: input, shape index: {}]   ;;  %s555_s1 = inlined_call_operand.vmem [shape: f32[32,32], index: 1, kind: input, shape index: {}]   ;;  %s556_s2 = inlined_call_operand.vmem [shape: f32[1,32], index: 2, kind: input, shape index: {}]   ;;  %s557_s3 = inlined_call_operand.hbm [shape: f32[32,32], index: 3, kind: input, shape index: {}]   ;;  %s558_s4 = inlined_call_operand.vmem [shape: f32[1,32], index: 4, kind: input, shape index: {}]   ;;  %s559_s5 = inlined_call_operand.vmem [shape: f32[32,16], index: 5, kind: input, shape index: {}]   ;;  %s560_s6 = inlined_call_operand.vmem [shape: f32[1,16], index: 6, kind: input, shape index: {}]   ;;  %s561_s7 = inlined_call_operand.hbm [shape: f32[8,16], index: 7, kind: output, shape index: {}]  }
   0x1   :  { %13 = vsyncpa [#allocation4], 0  ;;  %s441_s24 = smov [#allocation2]   ;;  %s393_s28 = scalar_lea.hbm %s557_s3, 512 }
   0x2   :  { %s25_s25 = sshll.u32 %s441_s24, 4  ;;  %p394_p0 = scmp.ne.s32.totalorder %s557_s3, %s393_s28  ;;  %s26_s25 = int_to_ptr.vmem [resolvable:$true] %s25_s25 }
   0x3   :  { %p397_p1 = scmp.lt.u32.totalorder %s393_s28, %s557_s3 }
   0x5   :  { %p399_p2 = pnand %p397_p1, %p394_p0 }
   0x7   :  { %402 = shalt.err (!%p399_p2)
}
   0x8   :  { %s403_s10 = scalar_lea.vmem %s26_s25, 512  ;;  %p408_p4 = scmp.lt.s32.totalorder %s26_s25, %s26_s25 }
   0x9   :  { %p404_p3 = scmp.ne.s32.totalorder %s26_s25, %s403_s10  ;;  %p409_p5 = scmp.lt.s32.totalorder %s403_s10, %s403_s10 }
   0xb   :  { %p410_p6 = por %p409_p5, %p408_p4 }
   0xd   :  { %p411_p7 = pnand %p410_p6, %p404_p3 }
   0xf   :  { %414 = shalt.err (!%p411_p7)
}
  0x10   :  { %s442_s11 = smov 128   ;;  %s443_s12 = smov 8  }
  0x11   :  { %31 = dma.hbm_to_vmem [thread:$0]  %s557_s3, 512, %s26_s25, [#allocation3], %s442_s11, %s442_s11, %s443_s12  }
  0x12   :  { %437 = dma.done.wait [#allocation3], 512  }
  0x13   :  { %438 = vsyncadd [#allocation3], 4294966784  ;;  %v444_v0 = vmov 0.0|0.0   ;;  %vm445_vm0 = vmmov 0   ;;  %v446_v1 = vmov 0.0   ;;  %v42_v2 = vld [vmem:[%s555_s1] sm:$0xff] }
  0x14   :  { %368 = vmatprep.subr.bf16.mxu0 %v444_v0  ;;  %343 = vmatprep.mubr.msk.f32.mxu0 %vm445_vm0, %v446_v1  ;;  %v43_v3 = vld [vmem:[%s555_s1 + $0x8] sm:$0xff]  ;;  %v44_v4 = vld [vmem:[%s555_s1 + $0x10] sm:$0xff]  ;;  %v45_v6 = vld [vmem:[%s555_s1 + $0x18] sm:$0xff]  ;;  %vm53_vm1 = vcmask 261120   ;;  %s447_s12 = smov [#allocation5]   ;;  %vm297_vm2 = vcmask 130048  }
  0x15   :  { %374 = vmatprep.subr.bf16.mxu1 %v444_v0  ;;  %354 = vmatprep.mubr.msk.f32.mxu1 %vm445_vm0, %v446_v1  ;;  %v369_v5 = vpack.c.bf16 %v43_v3, %v42_v2  ;;  %v128_v7 = vld [vmem:[#allocation2] sm:$0xff]  ;;  %v129_v8 = vld [vmem:[#allocation2 + $0x8] sm:$0xff]  ;;  %v372_v9 = vpack.c.bf16 %v45_v6, %v44_v4  ;;  %v130_v12 = vld [vmem:[#allocation2 + $0x10] sm:$0xff]  ;;  %s305_s13 = sshll.u32 %s447_s12, 4  ;;  %s306_s13 = int_to_ptr.vmem [resolvable:$true] %s305_s13 }
  0x16   :  { %v375_v10 = vpack.c.bf16 %v129_v8, %v128_v7  ;;  %v41_v11 = vld [vmem:[%s554_s0] sm:$0xff]  ;;  %v131_v13 = vld [vmem:[#allocation2 + $0x18] sm:$0xff]  ;;  %v214_v16 = vld [vmem:[%s559_s5 + $0x8] sm:$0xff]  ;;  %p420_p9 = scmp.lt.s32.totalorder %s306_s13, %s306_s13 }
  0x17   :  { %370 = vmatpush3.bf16.msra.mxu0 %v369_v5  ;;  %v378_v14 = vpack.c.bf16 %v131_v13, %v130_v12  ;;  %v213_v15 = vld [vmem:[%s559_s5] sm:$0xff]  ;;  %v215_v23 = vld [vmem:[%s559_s5 + $0x10] sm:$0xff]  ;;  %v216_v24 = vld [vmem:[%s559_s5 + $0x18] sm:$0xff]  ;;  %s415_s5 = scalar_lea.vmem %s306_s13, 128 }
  0x18   :  { %371 = vmatprep.subr.bf16.mxu0 %v444_v0  ;;  %376 = vmatpush3.bf16.msra.mxu1 %v375_v10  ;;  %v381_v17 = vpack.c.bf16 %v214_v16, %v213_v15  ;;  %v314_v18 = vld [vmem:[%s556_s2] ss:$0 sm:$0xff]  ;;  %v384_v25 = vpack.c.bf16 %v216_v24, %v215_v23  ;;  %p416_p8 = scmp.ne.s32.totalorder %s306_s13, %s415_s5  ;;  %p421_p10 = scmp.lt.s32.totalorder %s415_s5, %s415_s5 }
  0x19   :  { %377 = vmatprep.subr.bf16.mxu1 %v444_v0  ;;  %v316_v26 = vld [vmem:[%s558_s4] ss:$0 sm:$0xff] }
  0x1a   :  { %v318_v31 = vld [vmem:[%s560_s6] ss:$0 sm:$0xff]  ;;  %p422_p11 = por %p421_p10, %p420_p9 }
  0x1b   :  { %373 = vmatpush3.bf16.msra.mxu0 %v372_v9 }
  0x1c   :  { %380 = vmatprep.subr.bf16.mxu0 %v444_v0  ;;  %379 = vmatpush3.bf16.msra.mxu1 %v378_v14  ;;  %p423_p12 = pnand %p422_p11, %p416_p8 }
  0x1e   :  { %344 = vmatmul.mubr.msk.f32.vlgmr.msra.gmra.mrb[0].mxu0 %vm53_vm1, %v41_v11 }
  0x1f   :  { %365 = vmatprep.mubr.msk.f32.mxu0 %vm445_vm0, %v446_v1  ;;  %382 = vmatpush3.bf16.msra.mxu0 %v381_v17 }
  0x20   :  { %383 = vmatprep.subr.bf16.mxu0 %v444_v0 }
  0x23   :  { %385 = vmatpush3.bf16.msra.mxu0 %v384_v25 }
  0xf1   :  { %v123_v19 = vpop.f32.mrb[0].mxu0 }
  0xf2   :  { %v124_v20 = vadd.f32 %v314_v18, %v123_v19  ;;  %v345_v21 = vpop.f32.mrb[1].mxu0 }
  0xf4   :  { %v127_v22 = vmax.f32 %v124_v20, 0.0 }
  0xf6   :  { %355 = vmatmul.mubr.msk.f32.vlgmr.msra.gmra.mrb[0].mxu1 %vm53_vm1, %v127_v22 }
 0x1c9   :  { %v208_v27 = vpop.f32.mrb[0].mxu1 }
 0x1ca   :  { %v209_v28 = vadd.f32 %v316_v26, %v208_v27  ;;  %v356_v29 = vpop.f32.mrb[1].mxu1 }
 0x1cc   :  { %v212_v30 = vmax.f32 %v209_v28, 0.0 }
 0x1ce   :  { %366 = vmatmul.mubr.msk.f32.vlgmr.msra.gmra.mrb[2].mxu0 %vm53_vm1, %v212_v30 }
 0x2a1   :  { %v293_v32 = vpop.f32.mrb[2].mxu0 }
 0x2a2   :  { %v294_v33 = vadd.f32 %v318_v31, %v293_v32  ;;  %v367_v34 = vpop.f32.mrb[3].mxu0 }
 0x2a4   :  { %298 = vst.msk [vmem:[#allocation5] sm:$0xff] %vm297_vm2, %v294_v33 }
 0x2a5   :  { %426 = shalt.err (!%p423_p12)
}
 0x2a6   :  { %s427_s15 = scalar_lea.hbm %s561_s7, 128 }
 0x2a7   :  { %p428_p13 = scmp.ne.s32.totalorder %s561_s7, %s427_s15  ;;  %p431_p0 = scmp.lt.u32.totalorder %s427_s15, %s561_s7 }
 0x2a9   :  { %p433_p1 = pnand %p431_p0, %p428_p13 }
 0x2ab   :  { %436 = shalt.err (!%p433_p1)
}
 0x2ac   :  { %308 = dma.vmem_to_hbm [thread:$0]  %s306_s13, 128, %s561_s7, [#allocation4]  }
 0x2ad   :  { %439 = dma.done.wait [#allocation4], 128  }
 0x2ae   :  { %440 = vsyncadd [#allocation4], 4294967168 }
 0x2af   :  { %312 = vsyncpa [#allocation3], 1 }
 0x2b0   :  { %313 = vsyncpa [#allocation4], 1 }

</bundles_post_ra>
